<compile_context>
chip_gen: v7x
topology: tpu7x:2x2x1
jax: 0.10.0
libtpu: 0.0.40
codegen_flags: <defaults>
</compile_context>

<pallas_src>
import functools

import jax
import jax.numpy as jnp
from jax import lax
from jax.experimental import pallas as pl
from jax.experimental.pallas import tpu as pltpu


def _normalize_kernel(x_ref, o_ref, *, power):
    # x_ref / o_ref: (1, C, TILE_S, 128) or (1, C, TILE_HW) VMEM tiles.
    # The channel reduction (axis=1) is fully contained in the block and never
    # mixes lanes, so ragged-tile padding stays confined to dropped lanes.
    x = x_ref[...]
    xf = x.astype(jnp.float32)

    if power == 2:
        s = jnp.sum(xf * xf, axis=1, keepdims=True)
        inv = lax.rsqrt(s)                       # EUP slot, essentially free
    elif float(power).is_integer() and power > 0:
        ip = int(power)
        # Repeated VALU multiplies per element; the 1/p root runs once, only
        # on the reduced (1, 1, ...) tensor. (NaN for negative sums with odd
        # p — same behavior as torch.pow.)
        s = jnp.sum(lax.integer_pow(xf, ip), axis=1, keepdims=True)
        inv = jnp.exp(jnp.log(s) * (-1.0 / ip))
    else:
        # Fractional power: 2 transcendentals per element on the single EUP
        # slot -> EUP-bound, much slower than the p==2 path. Kept only for
        # full generality of the torch module.
        s = jnp.sum(jnp.power(xf, power), axis=1, keepdims=True)
        inv = jnp.power(s, -1.0 / power)

    # Scale in f32 (xf already exists) and cast exactly once on store.
    # No eps clamp, matching the torch module's x / norm exactly.
    o_ref[...] = (xf * inv).astype(o_ref.dtype)


def _target_block_bytes():
    """Per-generation target for the streamed block size (bytes)."""
    try:
        vmem_cap = int(pltpu.get_tpu_info().vmem_capacity_bytes)
    except Exception:
        vmem_cap = 128 << 20
    if vmem_cap <= (64 << 20):   # v7x-class: 64 MiB VMEM/TC, ~2.3x v6e HBM BW
        return 2 << 20
    return 1 << 20               # v5e/v6e: ~1 MiB blocks reach ~85% roofline


def _round_down(v, m):
    return (v // m) * m


def normalize(x, power=2):
    """x: (N, C, H, W). Returns x / ||x||_power along the channel dim."""
    N, C, H, W = x.shape
    HW = H * W
    itemsize = jnp.dtype(x.dtype).itemsize
    target_bytes = _target_block_bytes()

    if HW % 128 == 0:
        # Lane-dense 4-D view: channel axis leads, spatial splits into
        # (sublane, lane) = (S, 128). No sublane padding for small C; the
        # channel sum becomes cross-vreg VALU adds.
        S = HW // 128
        x_in = x.reshape(N, C, S, 128)
        if S <= 8:
            tile_s = S                               # equal-to-dim block is legal
        else:
            tile_s = max(8, _round_down(target_bytes // (C * 128 * itemsize), 8))
            tile_s = min(tile_s, ((S + 7) // 8) * 8)
            # Keep >= 4 grid steps when possible so v7x's 2 TCs both get work.
            while N * ((S + tile_s - 1) // tile_s) < 4 and tile_s > 8:
                tile_s = max(8, _round_down(tile_s // 2, 8))
        grid = (N, (S + tile_s - 1) // tile_s)
        block = (1, C, tile_s, 128)
        index_map = lambda n, t: (n, 0, t, 0)
        tile_elems = tile_s * 128
        out_struct = jax.ShapeDtypeStruct((N, C, S, 128), x.dtype)
    else:
        # Fallback 3-D layout with a ragged (masked) last spatial tile.
        x_in = x.reshape(N, C, HW)
        if HW <= 128:
            tile_hw = HW                             # single block, equal-to-dim
        else:
            tile_hw = max(128, _round_down(target_bytes // (C * itemsize), 128))
            tile_hw = min(tile_hw, ((HW + 127) // 128) * 128)
            while N * ((HW + tile_hw - 1) // tile_hw) < 4 and tile_hw > 128:
                tile_hw = max(128, _round_down(tile_hw // 2, 128))
        grid = (N, (HW + tile_hw - 1) // tile_hw)
        block = (1, C, tile_hw)
        index_map = lambda n, t: (n, 0, t)
        tile_elems = tile_hw
        out_struct = jax.ShapeDtypeStruct((N, C, HW), x.dtype)

    # VMEM budget: double-buffered in+out blocks plus f32 intermediates, with
    # headroom; capped so v7x (64 MiB/TC) keeps full double-buffering.
    block_bytes = C * tile_elems * itemsize
    block_f32_bytes = C * tile_elems * 4
    vmem_limit = int(min(max(4 << 20, 4 * block_bytes + 4 * block_f32_bytes),
                         40 << 20))

    out = pl.pallas_call(
        functools.partial(_normalize_kernel, power=power),
        out_shape=out_struct,
        grid_spec=pltpu.PrefetchScalarGridSpec(
            num_scalar_prefetch=0,
            grid=grid,
            in_specs=[pl.BlockSpec(block, index_map)],
            out_specs=pl.BlockSpec(block, index_map),
        ),
        compiler_params=pltpu.CompilerParams(
            dimension_semantics=("parallel", "parallel"),
            vmem_limit_bytes=vmem_limit,
        ),
    )(x_in)

    return out.reshape(N, C, H, W)


if __name__ == "__main__":
    key = jax.random.PRNGKey(0)

    # Primary case: lane-aligned spatial extent (4-D fast path).
    x = jax.random.normal(key, (2, 4, 16, 16), dtype=jnp.float32)
    y = jax.block_until_ready(normalize(x, power=2))
    norm_ref = jnp.power(jnp.sum(jnp.power(x, 2), axis=1, keepdims=True), 0.5)
    assert jnp.allclose(y, x / norm_ref, atol=1e-5, rtol=1e-5), "mismatch (aligned)"

    # Ragged spatial extent: exercises the masked last tile (no pad/slice).
    x2 = jax.random.normal(jax.random.PRNGKey(0), (2, 3, 18, 11), dtype=jnp.float32)
    y2 = jax.block_until_ready(normalize(x2, power=2))
    norm_ref2 = jnp.sqrt(jnp.sum(x2 * x2, axis=1, keepdims=True))
    assert jnp.allclose(y2, x2 / norm_ref2, atol=1e-5, rtol=1e-5), "mismatch (ragged)"

    print("KERNEL_OK")
</pallas_src>

<mosaic_0001>
module attributes {stable_mosaic.version = 11 : i64} {
  func.func @_normalize_kernel(%arg0: i32, %arg1: i32, %arg2: memref<1x4x2x128xf32, #tpu.memory_space<vmem>>, %arg3: memref<1x4x2x128xf32, #tpu.memory_space<vmem>>) attributes {dimension_semantics = [#tpu.dimension_semantics<parallel>, #tpu.dimension_semantics<parallel>], iteration_bounds = array<i64: 2, 1>, scalar_prefetch = 0 : i64, scratch_operands = 0 : i64, tpu.core_type = #tpu.core_type<tc>, window_params = [{transform_indices = @transform_0, window_bounds = array<i64: 1, 4, 2, 128>}, {transform_indices = @transform_1, window_bounds = array<i64: 1, 4, 2, 128>}]} {
    %c0 = arith.constant 0 : index
    %c0_0 = arith.constant 0 : index
    %c0_1 = arith.constant 0 : index
    %c0_2 = arith.constant 0 : index
    %0 = vector.load %arg2[%c0, %c0_0, %c0_1, %c0_2] : memref<1x4x2x128xf32, #tpu.memory_space<vmem>>, vector<1x4x2x128xf32>
    %1 = arith.mulf %0, %0 : vector<1x4x2x128xf32>
    %cst = arith.constant dense<0.000000e+00> : vector<1x2x128xf32>
    %2 = vector.multi_reduction <add>, %1, %cst [1] : vector<1x4x2x128xf32> to vector<1x2x128xf32>
    %3 = vector.shape_cast %2 : vector<1x2x128xf32> to vector<1x1x2x128xf32>
    %4 = math.rsqrt %3 : vector<1x1x2x128xf32>
    %5 = vector.broadcast %4 : vector<1x1x2x128xf32> to vector<1x4x2x128xf32>
    %6 = arith.mulf %0, %5 : vector<1x4x2x128xf32>
    %c0_3 = arith.constant 0 : index
    %c0_4 = arith.constant 0 : index
    %c0_5 = arith.constant 0 : index
    %c0_6 = arith.constant 0 : index
    %7 = vector.load %arg3[%c0_3, %c0_4, %c0_5, %c0_6] : memref<1x4x2x128xf32, #tpu.memory_space<vmem>>, vector<1x4x2x128xf32>
    tpu.vector_store %arg3[%c0_3, %c0_4, %c0_5, %c0_6], %6 {strides = array<i32>} : memref<1x4x2x128xf32, #tpu.memory_space<vmem>>, vector<1x4x2x128xf32>,
    return
  }
  func.func @transform_0(%arg0: i32, %arg1: i32) -> (i32, i32, i32, i32) {
    %c0_i32 = arith.constant 0 : i32
    %c0_i32_0 = arith.constant 0 : i32
    %c0_i32_1 = arith.constant 0 : i32
    return %arg0, %c0_i32, %arg1, %c0_i32_0 : i32, i32, i32, i32
  }
  func.func @transform_1(%arg0: i32, %arg1: i32) -> (i32, i32, i32, i32) {
    %c0_i32 = arith.constant 0 : i32
    %c0_i32_0 = arith.constant 0 : i32
    %c0_i32_1 = arith.constant 0 : i32
    return %arg0, %c0_i32, %arg1, %c0_i32_0 : i32, i32, i32, i32
  }
}

</mosaic_0001>

<bundles_post_ra>
// kernel: tpu_custom_call.1
= control target key start
LH: loop header
LB: loop body
LE: loop exit
PB: predicated region body
PF: predicated region fallthrough
CT: control target
= control target key end

     0   :  { %6 = vsyncpa [#allocation3], 0  ;;  %s667_s0 = inlined_call_operand.hbm [shape: f32[2,4,2,128], index: 0, kind: input, shape index: {}]   ;;  %s668_s1 = inlined_call_operand.hbm [shape: f32[2,4,2,128], index: 1, kind: output, shape index: {}]  }
   0x1   :  { %8 = vsyncpa [#allocation3 + $0x1], 0 }
   0x2   :  { %9 = vsyncpa [#allocation4], 0 }
   0x3   :  { %11 = vsyncpa [#allocation4 + $0x1], 0  ;;  %s492_s6 = smov 0   ;;  %s494_s7 = smov 0  }
   0x4   :  { %s496_s8 = smov 0   ;;  %s498_s9 = smov 0  }
   0x5   :  { %s500_s10 = smov 0   ;;  %s502_s11 = smov 0  }
   0x6 LB: > { %s277_s12 = sadd.s32 4294967295, %s474_s11   ;;  %s278_s13 = sadd.s32 4294967294, %s474_s11   ;;  %s474_s11 = sphi %s502_s11, %s17_s11   ;;  %s470_s10 = sphi %s500_s10, %s683_s10   ;;  %s466_s9 = sphi %s498_s9, %s682_s9   ;;  %s462_s8 = sphi %s496_s8, %s681_s8   ;;  %s458_s7 = sphi %s494_s7, %s680_s7   ;;  %s454_s6 = sphi %s492_s6, %s679_s6  }
   0x7   : > { %s29_s14 = sadd.s32 1, %s470_s10  ;;  %s38_s15 = sadd.s32 1, %s462_s8 }
   0x8   : > { %p31_p0 = scmp.ge.s32.totalorder %s29_s14, 2  ;;  %p45_p1 = scmp.ne.s32.totalorder %s462_s8, %s458_s7 }
   0x9   : > { %p46_p2 = scmp.eq.s32.totalorder %s474_s11, 0  ;;  %p51_p3 = scmp.ne.s32.totalorder %s458_s7, %s454_s6 }
   0xa   : > { %s685_s14 = smov (%p31_p0, %s29_s14), 0  ;;  %p52_p5 = scmp.eq.s32.totalorder %s277_s12, 0 }
   0xb   : > { %p533_p4 = por %p46_p2, %p45_p1  ;;  %s33_s17 = ssub.s32 %s470_s10, %s685_s14 }
   0xc   : > { %p77_p6 = scmp.eq.s32.totalorder %s277_s12, 1  ;;  %p36_p7 = scmp.eq.s32.totalorder %s33_s17, 0 }
   0xd   : > { %p539_p8 = por %p52_p5, %p51_p3  ;;  %p83_p10 = scmp.eq.s32.totalorder %s278_s13, 1 }
   0xe   : > { %p543_p9 = por %p77_p6, %p45_p1  ;;  %p306_p13 = scmp.lt.s32.totalorder %s474_s11, 2 }
   0xf   : > { %s548_s20 = scalar_select %p36_p7, %s462_s8, %s38_s15  }
  0x10   : > { %s672_s19 = scalar_select %p543_p9, 1, 0 }
  0x11   : > { %p550_p11 = por %p83_p10, %p51_p3  ;;  %s103_s22 = sand.u32 1, %s462_s8  }
  0x12   : > { %s281_s23 = sshll.u32 %s103_s22, 3  ;;  %s292_s24 = sshll.u32 %s470_s10, 7 }
  0x13   : > { %s673_s21 = scalar_select %p550_p11, 1, 0 }
  0x14   : > { %s561_s27 = scalar_lea.hbm %s667_s0, %s292_s24  ;;  %s107_s28 = scalar_lea.vmem [#allocation2], %s281_s23 }
  0x15   : > { %s115_s29 = sshll.u32 %s107_s28, 4  ;;  %p567_p0 = pnand %p306_p13, %p533_p4  ;;  %s563_s29 = int_to_ptr.vmem [resolvable:$true] %s115_s29 }
  0x16   : > { %s572_s2 = scalar_lea.sflag [#allocation3], %s103_s22  ;;  %s362_s3 = scalar_lea.hbm %s561_s27, 128 }
  0x17   : > { %p363_p2 = scmp.ne.s32.totalorder %s561_s27, %s362_s3  ;;  %p364_p3 = pneg %p567_p0 }
  0x18   : > { %s367_s12 = scalar_lea.hbm %s667_s0, 256  ;;  %p368_p4 = scmp.lt.u32.totalorder %s561_s27, %s667_s0 }
  0x19   : > { %p365_p5 = pnand %p364_p3, %p363_p2  ;;  %p369_p7 = scmp.lt.u32.totalorder %s367_s12, %s362_s3 }
  0x1a   : > { %p371_p13 = scmp.lt.u32.totalorder %s362_s3, %s561_s27 }
  0x1b   : > { %p366_p6 = pneg %p365_p5  ;;  %p370_p10 = por %p369_p7, %p368_p4 }
  0x1d   : > { %p372_p12 = por %p371_p13, %p370_p10 }
  0x1f   : > { %p373_p1 = pnand %p372_p12, %p366_p6 }
  0x21   : > { %376 = shalt.err (!%p373_p1)
}
  0x22   : > { %s377_s16 = scalar_lea.vmem %s563_s29, 128  ;;  %s476_s17 = smov [#allocation2]  }
  0x23   : > { %p378_p2 = scmp.ne.s32.totalorder %s563_s29, %s377_s16  ;;  %s382_s22 = sshll.u32 %s476_s17, 4  ;;  %s383_s22 = int_to_ptr.vmem [resolvable:$false] %s382_s22 }
  0x24   : > { %s384_s23 = scalar_lea.vmem %s383_s22, 256  ;;  %p385_p9 = scmp.lt.s32.totalorder %s563_s29, %s383_s22 }
  0x25   : > { %p380_p5 = pnand %p378_p2, %p364_p3  ;;  %p386_p4 = scmp.lt.s32.totalorder %s384_s23, %s377_s16 }
  0x27   : > { %p381_p11 = pneg %p380_p5  ;;  %p387_p7 = por %p386_p4, %p385_p9 }
  0x29   : > { %p388_p10 = pnand %p387_p7, %p381_p11 }
  0x2b   : > { %391 = shalt.err (!%p388_p10)
}
  0x2c   : > { %s477_s24 = smov 32   ;;  %s478_s25 = smov 2  }
  0x2d   : > { %301 = dma.hbm_to_vmem [thread:$0]  (!%p567_p0), %s561_s27, 128, %s563_s29, %s572_s2, %s477_s24, %s477_s24, %s478_s25  }
  0x2e   : > { %p123_p12 = scmp.lt.s32.totalorder %s474_s11, 3  ;;  %p675_p1 = scmp.ge.s32.totalorder %s474_s11, 1 }
  0x30   : > { %p124_p3 = pnand %p675_p1, %p123_p12 }
  0x31   : > { %s604_s26 = sand.u32 (!%p124_p3), 1, %s458_s7  }
  0x32   : > { %127 = sbr.rel (%p124_p3) target bundleno = 97 (0x61), region = 24  ;;  %s285_s28 = sshll.u32 (!%p124_p3), %s604_s26, 3 }
  0x33   : > { %s130_s3 = scalar_lea.sflag (!%p124_p3), [#allocation3], %s604_s26  ;;  %s133_s4 = scalar_lea.vmem (!%p124_p3), [#allocation2], %s285_s28 }
  0x39   : > { %445 = dma.done.wait (%p539_p8), %s130_s3, 128  }
  0x3a   : > { %447 = vsyncadd (%p539_p8), %s130_s3, 4294967168  ;;  %vm160_vm0 = vcmask 1041408   ;;  %v152_v0 = vld [vmem:[%s133_s4] sm:$0x3]  ;;  %v153_v1 = vld [vmem:[%s133_s4 + $0x2] sm:$0x3] }
  0x3b   : > { %v154_v2 = vld [vmem:[%s133_s4 + $0x4] sm:$0x3]  ;;  %v155_v3 = vld [vmem:[%s133_s4 + $0x6] sm:$0x3]  ;;  %v156_v4 = vmul.f32 %v152_v0, %v152_v0  ;;  %v157_v5 = vmul.f32 %v153_v1, %v153_v1  ;;  %s151_s18 = scalar_lea.vmem [#allocation5], %s285_s28  ;;  %s293_s29 = sshll.u32 %s466_s9, 7 }
  0x3c   : > { %v158_v6 = vmul.f32 %v154_v2, %v154_v2  ;;  %v159_v7 = vmul.f32 %v155_v3, %v155_v3  ;;  %s192_s27 = sshll.u32 %s151_s18, 4  ;;  %s618_s5 = scalar_lea.hbm %s668_s1, %s293_s29  ;;  %s613_s27 = int_to_ptr.vmem [resolvable:$true] %s192_s27 }
  0x3d   : > { %v161_v8 = vsel %vm160_vm0, %v156_v4, 0.0  ;;  %v162_v9 = vsel %vm160_vm0, %v157_v5, 0.0  ;;  %s178_s9 = scalar_lea.sflag [#allocation4], %s604_s26  ;;  %s392_s12 = scalar_lea.vmem %s613_s27, 128 }
  0x3e   : > { %v164_v10 = vsel %vm160_vm0, %v158_v6, 0.0  ;;  %v163_v11 = vadd.f32 %v162_v9, %v161_v8  ;;  %v166_v12 = vsel %vm160_vm0, %v159_v7, 0.0  ;;  %p393_p8 = scmp.ne.s32.totalorder %s613_s27, %s392_s12  ;;  %p676_p9 = scmp.ne.s32.totalorder %s672_s19, 0 }
  0x3f   : > { %s479_s13 = smov [#allocation5]  }
  0x40   : > { %v165_v13 = vadd.f32 %v164_v10, %v163_v11  ;;  %p394_p11 = pnand %p393_p8, %p676_p9  ;;  %s396_s15 = sshll.u32 %s479_s13, 4  ;;  %s397_s15 = int_to_ptr.vmem [resolvable:$false] %s396_s15 }
  0x41   : > { %s398_s16 = scalar_lea.vmem %s397_s15, 256  ;;  %p399_p6 = scmp.lt.s32.totalorder %s613_s27, %s397_s15 }
  0x42   : > { %v167_v14 = vadd.f32 %v166_v12, %v165_v13  ;;  %p395_p0 = pneg %p394_p11  ;;  %p400_p13 = scmp.lt.s32.totalorder %s398_s16, %s392_s12 }
  0x44   : > { %360 = vrsqrt.f32 %v167_v14  ;;  %p401_p2 = por %p400_p13, %p399_p6 }
  0x46   : > { %p402_p5 = pnand %p401_p2, %p395_p0 }
  0x4e   : > { %v361_v15 = vpop.eup %360 }
  0x4f   : > { %v169_v16 = vmul.f32 %v361_v15, %v152_v0  ;;  %v170_v17 = vmul.f32 %v361_v15, %v153_v1  ;;  %v171_v18 = vmul.f32 %v361_v15, %v154_v2  ;;  %v172_v19 = vmul.f32 %v361_v15, %v155_v3 }
  0x51   : > { %173 = vst [vmem:[%s151_s18] sm:$0x3] %v169_v16  ;;  %174 = vst [vmem:[%s151_s18 + $0x2] sm:$0x3] %v170_v17 }
  0x52   : > { %175 = vst [vmem:[%s151_s18 + $0x4] sm:$0x3] %v171_v18  ;;  %176 = vst [vmem:[%s151_s18 + $0x6] sm:$0x3] %v172_v19 }
  0x53   : > { %405 = shalt.err (!%p402_p5)
}
  0x54   : > { %s406_s17 = scalar_lea.hbm %s618_s5, 128  ;;  %s410_s24 = scalar_lea.hbm %s668_s1, 256 }
  0x55   : > { %p407_p4 = scmp.ne.s32.totalorder %s618_s5, %s406_s17  ;;  %p411_p12 = scmp.lt.u32.totalorder %s618_s5, %s668_s1 }
  0x56   : > { %p412_p1 = scmp.lt.u32.totalorder %s410_s24, %s406_s17  ;;  %p414_p8 = scmp.lt.u32.totalorder %s406_s17, %s618_s5 }
  0x57   : > { %p408_p7 = pnand %p407_p4, %p676_p9 }
  0x58   : > { %p413_p3 = por %p412_p1, %p411_p12 }
  0x59   : > { %p409_p10 = pneg %p408_p7 }
  0x5a   : > { %p415_p11 = por %p414_p8, %p413_p3 }
  0x5c   : > { %p416_p0 = pnand %p415_p11, %p409_p10 }
  0x5e   : > { %419 = shalt.err (!%p416_p0)
}
  0x5f   : > { %s480_s3 = smov 32   ;;  %s481_s4 = smov 2  }
  0x60   : > { %296 = dma.vmem_to_hbm [thread:$0]  (%p676_p9), %s613_s27, 128, %s618_s5, %s178_s9, %s480_s3, %s480_s3, %s481_s4  }
  0x61 PF: > { %s207_s18 = sand.u32 1, %s454_s6   ;;  %p677_p6 = scmp.ne.s32.totalorder %s673_s21, 0 }
  0x62   : > { %p678_p13 = scmp.ge.s32.totalorder %s474_s11, 2  ;;  %s208_s29 = scalar_lea.sflag [#allocation4], %s207_s18 }
  0x64   : > { %p303_p2 = pnand %p678_p13, %p677_p6 }
  0x66   : > { %449 = dma.done.wait (!%p303_p2), %s208_s29, 128  }
  0x67   : > { %451 = vsyncadd (!%p303_p2), %s208_s29, 4294967168  ;;  %s17_s11 = sadd.s32 1, %s474_s11   ;;  %s679_s6 = smov %s458_s7 }
  0x68   : > { %p14_p5 = scmp.ge.s32.totalorder %s17_s11, 4   ;;  %s680_s7 = smov %s462_s8 }
  0x69   : > { %s681_s8 = smov %s548_s20  ;;  %s682_s9 = smov %s470_s10 }
  0x6a   : > { %s683_s10 = smov %s685_s14  ;;  %16 = sbr.rel (!%p14_p5) target bundleno = 6 (0x6), region = 69 }
  0x71   :  { %213 = vsyncpa [#allocation3], 1 }
  0x72   :  { %215 = vsyncpa [#allocation3 + $0x1], 1 }
  0x73   :  { %216 = vsyncpa [#allocation4], 1 }
  0x74   :  { %218 = vsyncpa [#allocation4 + $0x1], 1 }

</bundles_post_ra>
